<compile_context>
chip_gen: v7x
topology: tpu7x:2x2x1
jax: 0.10.0
libtpu: 0.0.40
codegen_flags: <defaults>
</compile_context>

<pallas_src>
import jax
import jax.numpy as jnp
from jax.experimental import pallas as pl
from jax.experimental.pallas import tpu as pltpu


def _normalize_kernel(x_ref, scale_ref, shift_ref, o_ref):
    # (TM, TW) * (TM, 1) + (TM, 1): per-row affine, broadcast along lanes (VPU).
    x = x_ref[...].astype(jnp.float32)
    y = x * scale_ref[...] + shift_ref[...]
    o_ref[...] = y.astype(o_ref.dtype)


def _pick_tiles(nc, hw, itemsize):
    """Block sizes satisfying the (8,128) rule and a conservative VMEM budget."""
    # Lane (last) dim: multiple of 128, or the full extent.
    if hw % 128 == 0:
        tw = min(hw, 16 * 1024)
    else:
        tw = hw
    # Row dim: multiple of 8, or the full extent.  Keep each block to ~4 MiB so
    # the auto-pipeline's double-buffered in+out pair stays well inside every
    # generation's scoped VMEM default.
    budget_bytes = 4 * 1024 * 1024
    rows = max(8, budget_bytes // max(1, tw * itemsize))
    if nc <= rows:
        tm = nc                      # full extent (always legal)
    else:
        tm = max(8, (rows // 8) * 8)  # multiple of 8
    return tm, tw


@jax.jit
def normalize(tensor, annots, mean, std):
    """tensor: (N, C, H, W) float; annots: any array (returned unchanged);
    mean, std: (C,) per-channel statistics."""
    N, C, H, W = tensor.shape
    nc, hw = N * C, H * W
    x2d = tensor.reshape(nc, hw)

    mean = jnp.asarray(mean, jnp.float32).reshape(C)
    std = jnp.asarray(std, jnp.float32).reshape(C)
    inv_std = 1.0 / std
    scale_rows = jnp.tile(inv_std, N).reshape(nc, 1)           # 1/std[c] per row
    shift_rows = jnp.tile(-mean * inv_std, N).reshape(nc, 1)   # -mean[c]/std[c]

    tm, tw = _pick_tiles(nc, hw, x2d.dtype.itemsize)
    grid = (pl.cdiv(nc, tm), pl.cdiv(hw, tw))

    out2d = pl.pallas_call(
        _normalize_kernel,
        out_shape=jax.ShapeDtypeStruct((nc, hw), tensor.dtype),
        grid_spec=pltpu.PrefetchScalarGridSpec(
            num_scalar_prefetch=0,
            grid=grid,
            in_specs=[
                pl.BlockSpec((tm, tw), lambda i, j: (i, j)),
                pl.BlockSpec((tm, 1), lambda i, j: (i, 0)),  # grid-invariant on lanes
                pl.BlockSpec((tm, 1), lambda i, j: (i, 0)),
            ],
            out_specs=pl.BlockSpec((tm, tw), lambda i, j: (i, j)),
        ),
        compiler_params=pltpu.CompilerParams(
            dimension_semantics=("parallel", "parallel"),
            vmem_limit_bytes=32 * 1024 * 1024,
        ),
    )(x2d, scale_rows, shift_rows)

    # annots are returned unchanged, exactly like the PyTorch module.
    return out2d.reshape(N, C, H, W), annots


if __name__ == "__main__":
    key = jax.random.PRNGKey(0)
    k_img, k_annot = jax.random.split(key)

    N, C, H, W = 2, 4, 16, 16
    A = 8  # number of annotations (passed through untouched)
    img = jax.random.normal(k_img, (N, C, H, W), dtype=jnp.float32)
    annots = jax.random.uniform(k_annot, (A, 4), minval=0.0, maxval=float(W),
                                dtype=jnp.float32)

    mean = jnp.array([0.485, 0.456, 0.406, 0.500], dtype=jnp.float32)
    std = jnp.array([0.229, 0.224, 0.225, 0.250], dtype=jnp.float32)

    out_img, out_annots = normalize(img, annots, mean, std)
    jax.block_until_ready((out_img, out_annots))

    # validate against a pure-JAX reference
    ref_img = (img - mean[None, :, None, None]) / std[None, :, None, None]
    assert jnp.allclose(out_img, ref_img, atol=1e-5, rtol=1e-5)
    assert jnp.array_equal(out_annots, annots)

    print("KERNEL_OK")
</pallas_src>

<mosaic_0001>
module attributes {stable_mosaic.version = 11 : i64} {
  func.func @_normalize_kernel(%arg0: i32, %arg1: i32, %arg2: memref<8x256xf32, #tpu.memory_space<vmem>>, %arg3: memref<8x1xf32, #tpu.memory_space<vmem>>, %arg4: memref<8x1xf32, #tpu.memory_space<vmem>>, %arg5: memref<8x256xf32, #tpu.memory_space<vmem>>) attributes {dimension_semantics = [#tpu.dimension_semantics<parallel>, #tpu.dimension_semantics<parallel>], iteration_bounds = array<i64: 1, 1>, scalar_prefetch = 0 : i64, scratch_operands = 0 : i64, tpu.core_type = #tpu.core_type<tc>, window_params = [{transform_indices = @transform_0, window_bounds = array<i64: 8, 256>}, {transform_indices = @transform_1, window_bounds = array<i64: 8, 1>}, {transform_indices = @transform_2, window_bounds = array<i64: 8, 1>}, {transform_indices = @transform_3, window_bounds = array<i64: 8, 256>}]} {
    %c0 = arith.constant 0 : index
    %c0_0 = arith.constant 0 : index
    %0 = vector.load %arg2[%c0, %c0_0] : memref<8x256xf32, #tpu.memory_space<vmem>>, vector<8x256xf32>
    %c0_1 = arith.constant 0 : index
    %c0_2 = arith.constant 0 : index
    %1 = vector.load %arg3[%c0_1, %c0_2] : memref<8x1xf32, #tpu.memory_space<vmem>>, vector<8x1xf32>
    %2 = vector.broadcast %1 : vector<8x1xf32> to vector<8x256xf32>
    %3 = arith.mulf %0, %2 : vector<8x256xf32>
    %c0_3 = arith.constant 0 : index
    %c0_4 = arith.constant 0 : index
    %4 = vector.load %arg4[%c0_3, %c0_4] : memref<8x1xf32, #tpu.memory_space<vmem>>, vector<8x1xf32>
    %5 = vector.broadcast %4 : vector<8x1xf32> to vector<8x256xf32>
    %6 = arith.addf %3, %5 : vector<8x256xf32>
    %c0_5 = arith.constant 0 : index
    %c0_6 = arith.constant 0 : index
    %7 = vector.load %arg5[%c0_5, %c0_6] : memref<8x256xf32, #tpu.memory_space<vmem>>, vector<8x256xf32>
    tpu.vector_store %arg5[%c0_5, %c0_6], %6 {strides = array<i32>} : memref<8x256xf32, #tpu.memory_space<vmem>>, vector<8x256xf32>,
    return
  }
  func.func @transform_0(%arg0: i32, %arg1: i32) -> (i32, i32) {
    %c0_i32 = arith.constant 0 : i32
    return %arg0, %arg1 : i32, i32
  }
  func.func @transform_1(%arg0: i32, %arg1: i32) -> (i32, i32) {
    %c0_i32 = arith.constant 0 : i32
    %c0_i32_0 = arith.constant 0 : i32
    return %arg0, %c0_i32 : i32, i32
  }
  func.func @transform_2(%arg0: i32, %arg1: i32) -> (i32, i32) {
    %c0_i32 = arith.constant 0 : i32
    %c0_i32_0 = arith.constant 0 : i32
    return %arg0, %c0_i32 : i32, i32
  }
  func.func @transform_3(%arg0: i32, %arg1: i32) -> (i32, i32) {
    %c0_i32 = arith.constant 0 : i32
    return %arg0, %arg1 : i32, i32
  }
}

</mosaic_0001>

<bundles_post_ra>
// kernel: tile.0
= control target key start
LH: loop header
LB: loop body
LE: loop exit
PB: predicated region body
PF: predicated region fallthrough
CT: control target
= control target key end

     0   :  { %s34_s8 = smov 125   ;;  %vm7_vm0 = vcmask 7168   ;;  %s35_s11 = smov 126   ;;  %s61_s0 = inlined_call_operand.vmem [shape: f32[2,4], index: 0, kind: input, shape index: {}]   ;;  %s62_s1 = inlined_call_operand.vmem [shape: f32[8,1], index: 1, kind: output, shape index: {}]  }
   0x1   :  { %v4_v0 = vld [vmem:[%s61_s0] sm:$0x3]  ;;  %s33_s0 = smov 127  }
   0x2   :  { %5 = vst [vmem:[#allocation0] sm:$0x3] %v4_v0 }
   0x9   :  { %v9_v1 = vld [vmem:[#allocation0] sm:$0x3]  }
   0xa   :  { %v21_v2 = vld [vmem:[#allocation0] sm:$0x3]   ;;  %10 = vrot.lane.b32.xlu0 %v9_v1, %s33_s0 }
   0xb   :  { %22 = vrot.lane.b32.xlu1 %v21_v2, %s34_s8  ;;  %v6_v3 = vld [vmem:[#allocation0] sm:$0x3]  }
   0xc   :  { %v15_v4 = vld [vmem:[#allocation0] sm:$0x3]   ;;  %8 = vst.msk [vmem:[%s62_s1] ss:$4 sm:$0x3] %vm7_vm0, %v6_v3  }
   0xe   :  { %16 = vrot.lane.b32.xlu0 %v15_v4, %s35_s11 }
  0x7c   :  { %v11_v5 = vpop.permute.xlu0 %10  }
  0x7d   :  { %v23_v6 = vpop.permute.xlu1 %22   ;;  %27 = vst.msk [vmem:[%s62_s1 + $0x1] ss:$4 sm:$0x3] %vm7_vm0, %v11_v5  }
  0x7e   :  { %29 = vst.msk [vmem:[%s62_s1 + $0x3] ss:$4 sm:$0x3] %vm7_vm0, %v23_v6  }
  0x80   :  { %v17_v7 = vpop.permute.xlu0 %16  }
  0x81   :  { %28 = vst.msk [vmem:[%s62_s1 + $0x2] ss:$4 sm:$0x3] %vm7_vm0, %v17_v7  }

// kernel: tile.13
= control target key start
LH: loop header
LB: loop body
LE: loop exit
PB: predicated region body
PF: predicated region fallthrough
CT: control target
= control target key end

     0   :  { %s22_s0 = inlined_call_operand.vmem [shape: f32[4], index: 0, kind: input, shape index: {}]   ;;  %s23_s1 = inlined_call_operand.vmem [shape: f32[2,4], index: 1, kind: output, shape index: {}]  }
   0x1   :  { %v4_v0 = vld [vmem:[%s22_s0] ss:$0 sm:$0xff] }
   0x2   :  { %5 = vst [vmem:[%s23_s1] sm:$0x3] %v4_v0 }

// kernel: normalize.1
= control target key start
LH: loop header
LB: loop body
LE: loop exit
PB: predicated region body
PF: predicated region fallthrough
CT: control target
= control target key end

     0   :  { %v40_v0 = vmov 0   ;;  %s79_s1 = inlined_call_operand.vmem [shape: f32[8,1], index: 1, kind: input, shape index: {}]   ;;  %s80_s2 = inlined_call_operand.vmem [shape: f32[8,1], index: 2, kind: input, shape index: {}]   ;;  %s81_s0 = inlined_call_operand.vmem [shape: f32[8,256], index: 0, kind: input, shape index: {}]   ;;  %s82_s3 = inlined_call_operand.vmem [shape: f32[8,256], index: 3, kind: output, shape index: {}]  }
   0x1   :  { %39 = vset.pattern.permute.xlu0 %v40_v0  ;;  %v16_v1 = vld [vmem:[%s79_s1] sm:$0xff]  ;;  %v15_v5 = vld [vmem:[%s81_s0 + $0x8] sm:$0xff] }
   0x2   :  { %19 = vperm.xlu0 %39, %v16_v1   ;;  %v24_v2 = vld [vmem:[%s80_s2] sm:$0xff] }
   0x3   :  { %v14_v4 = vld [vmem:[%s81_s0] sm:$0xff] }
   0x6   :  { %27 = vperm.xlu0 %39, %v24_v2  }
  0x81   :  { %v20_v3 = vpop.permute.xlu0 %19 }
  0x82   :  { %v22_v6 = vmul.f32 %v20_v3, %v14_v4  ;;  %v23_v7 = vmul.f32 %v20_v3, %v15_v5 }
  0x85   :  { %v28_v8 = vpop.permute.xlu0 %27 }
  0x86   :  { %v30_v9 = vadd.f32 %v28_v8, %v22_v6  ;;  %v31_v10 = vadd.f32 %v28_v8, %v23_v7 }
  0x88   :  { %32 = vst [vmem:[%s82_s3] sm:$0xff] %v30_v9  ;;  %33 = vst [vmem:[%s82_s3 + $0x8] sm:$0xff] %v31_v10 }

</bundles_post_ra>
